<compile_context>
chip_gen: v7x
topology: tpu7x:2x2x1
jax: 0.10.0
libtpu: 0.0.40
codegen_flags: <defaults>
</compile_context>

<pallas_src>
import jax
import jax.numpy as jnp
from jax import lax
from jax.experimental import pallas as pl
from jax.experimental.pallas import tpu as pltpu


def _fused_kernel(x_ref, xm_ref, pool_ref, bbw_ref, bbb_ref,
                  w1_ref, s1_ref, t1_ref,
                  w2_ref, s2_ref, t2_ref,
                  wfc_ref, fcb_ref, o_ref):
    # ---- backbone stand-in: pointwise conv + bias + ReLU ------------------
    # x is already (Cin, B*HW) bf16 (lane-dense H*W, batch side-by-side);
    # one MXU matmul covers the whole batch.
    y = jnp.dot(bbw_ref[...], x_ref[...],
                preferred_element_type=jnp.float32)            # (feat, B*HW) f32
    y = jnp.maximum(y + bbb_ref[...], 0.0)                     # bias + ReLU

    # ---- global average pool ----------------------------------------------
    # Precomputed block-diagonal (1/HW) matrix; contracting the shared B*HW
    # axis with dot_general avoids any explicit transpose of y and lands the
    # features directly as row-major, lane-dense (B, feat) f32.
    feats = lax.dot_general(pool_ref[...], y,
                            dimension_numbers=(((1,), (1,)), ((), ())),
                            preferred_element_type=jnp.float32)  # (B, feat)

    # ---- meta MLP: Linear -> folded BN -> SiLU (x2); Dropout(0.3) = identity
    # Kept f32 end-to-end (FLOPs negligible; avoids bf16 pack/convert on v5e).
    z = jnp.dot(xm_ref[...], w1_ref[...], preferred_element_type=jnp.float32)
    z = z * s1_ref[...] + t1_ref[...]
    z = z * jax.nn.sigmoid(z)                                   # SiLU
    z = jnp.dot(z, w2_ref[...], preferred_element_type=jnp.float32)
    z = z * s2_ref[...] + t2_ref[...]
    z = z * jax.nn.sigmoid(z)                                   # SiLU

    # ---- head: myfc over concat(feats, meta) == ONE fused dot -------------
    # Both halves are 128 lanes wide -> the lane concat is vreg-aligned.
    # The 5x Dropout(0.5) passes are identity in eval, so the mean is just y.
    cat = jnp.concatenate([feats, z], axis=-1)                  # (B, feat + h2)
    out = jnp.dot(cat, wfc_ref[...], preferred_element_type=jnp.float32)
    o_ref[...] = out + fcb_ref[...]


def resnest_face_conditions_forward(params, x, x_meta, out_dim):
    B, C, H, W = x.shape
    HW = H * W

    # Lay the batch side by side along the lane axis in the wrapper: a ~8 KB
    # XLA transpose that fuses into the input DMA. Cast the big activation to
    # bf16 here (halves the HBM->VMEM bytes; no in-kernel cast).
    x_all = jnp.transpose(x.reshape(B, C, HW), (1, 0, 2)).reshape(C, B * HW)
    x_all = x_all.astype(jnp.bfloat16)

    # Precomputed block-diagonal average-pool matrix (B, B*HW); all inputs are
    # static, so XLA constant-folds this at compile time (nothing is rebuilt
    # inside the kernel per call).
    col_img = jnp.arange(B * HW, dtype=jnp.int32) // HW
    pool = (jnp.arange(B, dtype=jnp.int32)[:, None] == col_img[None, :])
    pool = pool.astype(jnp.float32) * (1.0 / HW)                # (B, B*HW) f32

    out_pad = params["fc_w"].shape[1]
    out = pl.pallas_call(
        _fused_kernel,
        out_shape=jax.ShapeDtypeStruct((B, out_pad), jnp.float32),
    )(x_all, x_meta, pool,
      params["bb_wT"], params["bb_b"],
      params["m_w1"], params["m_s1"], params["m_t1"],
      params["m_w2"], params["m_s2"], params["m_t2"],
      params["fc_w"], params["fc_b"])
    return out[:, :out_dim]


def init_params(key, cin, feat_dim, n_meta, n_meta_dim, out_dim, eps=1e-5):
    ks = jax.random.split(key, 12)
    h1, h2 = n_meta_dim
    out_pad = ((out_dim + 127) // 128) * 128

    # Backbone stand-in (1x1 conv).  Weight stored (feat, Cin) in bf16 so the
    # big activation keeps H*W on the lane axis inside the kernel.
    bb_wT = jax.random.normal(ks[0], (feat_dim, cin), jnp.float32) * 0.1
    bb_b = jax.random.normal(ks[1], (feat_dim, 1), jnp.float32) * 0.01

    # Meta layer 1: Linear(n_meta, h1) + BatchNorm1d(h1) folded (eval mode).
    w1 = jax.random.normal(ks[2], (n_meta, h1), jnp.float32) * 0.05
    b1 = jax.random.normal(ks[3], (h1,), jnp.float32) * 0.01
    g1 = 1.0 + 0.1 * jax.random.normal(ks[4], (h1,), jnp.float32)
    be1 = 0.1 * jax.random.normal(ks[5], (h1,), jnp.float32)
    mu1 = 0.05 * jax.random.normal(ks[6], (h1,), jnp.float32)
    var1 = jnp.abs(jax.random.normal(ks[7], (h1,), jnp.float32)) + 0.5
    s1 = g1 / jnp.sqrt(var1 + eps)
    t1 = (b1 - mu1) * s1 + be1

    # Meta layer 2: Linear(h1, h2) + BatchNorm1d(h2) folded (eval mode).
    w2 = jax.random.normal(ks[8], (h1, h2), jnp.float32) * 0.05
    b2 = jax.random.normal(ks[9], (h2,), jnp.float32) * 0.01
    g2 = 1.0 + 0.1 * jax.random.normal(ks[10], (h2,), jnp.float32)
    be2 = jnp.zeros((h2,), jnp.float32)
    mu2 = jnp.zeros((h2,), jnp.float32)
    var2 = jnp.ones((h2,), jnp.float32)
    s2 = g2 / jnp.sqrt(var2 + eps)
    t2 = (b2 - mu2) * s2 + be2

    # myfc: Linear(feat_dim + h2, out_dim), kept stacked (so the head is ONE
    # K=feat_dim+h2 matmul over concat(feats, meta)) and zero-padded to a
    # lane-dense (multiple-of-128) output width.  f32 (tiny).
    fc_w = jax.random.normal(ks[11], (feat_dim + h2, out_dim), jnp.float32) * 0.05
    fc_b = jnp.zeros((out_dim,), jnp.float32)
    fc_wp = jnp.zeros((feat_dim + h2, out_pad), jnp.float32).at[:, :out_dim].set(fc_w)
    fc_bp = jnp.zeros((1, out_pad), jnp.float32).at[0, :out_dim].set(fc_b)

    return {
        "bb_wT": bb_wT.astype(jnp.bfloat16), "bb_b": bb_b,
        "m_w1": w1,
        "m_s1": s1.reshape(1, h1), "m_t1": t1.reshape(1, h1),
        "m_w2": w2,
        "m_s2": s2.reshape(1, h2), "m_t2": t2.reshape(1, h2),
        "fc_w": fc_wp, "fc_b": fc_bp,
    }


if __name__ == "__main__":
    key = jax.random.PRNGKey(0)
    k_x, k_m, k_p = jax.random.split(key, 3)

    B, Cin, H, W = 2, 4, 16, 16
    feat_dim = 128            # stand-in for resnest101's 2048-d features
    n_meta = 16
    n_meta_dim = [512, 128]   # module defaults
    out_dim = 16

    x = jax.random.normal(k_x, (B, Cin, H, W), jnp.float32)       # NCHW (PyTorch)
    x_meta = jax.random.normal(k_m, (B, n_meta), jnp.float32)
    params = init_params(k_p, Cin, feat_dim, n_meta, n_meta_dim, out_dim)

    fwd = jax.jit(resnest_face_conditions_forward, static_argnums=(3,))
    out = jax.block_until_ready(fwd(params, x, x_meta, out_dim))
    assert out.shape == (B, out_dim)
    assert bool(jnp.all(jnp.isfinite(out)))
    print("KERNEL_OK")
</pallas_src>

<mosaic_0001>
module attributes {stable_mosaic.version = 11 : i64} {
  func.func @_fused_kernel(%arg0: memref<4x512xbf16, #tpu.memory_space<vmem>>, %arg1: memref<2x16xf32, #tpu.memory_space<vmem>>, %arg2: memref<2x512xf32, #tpu.memory_space<vmem>>, %arg3: memref<128x4xbf16, #tpu.memory_space<vmem>>, %arg4: memref<128x1xf32, #tpu.memory_space<vmem>>, %arg5: memref<16x512xf32, #tpu.memory_space<vmem>>, %arg6: memref<1x512xf32, #tpu.memory_space<vmem>>, %arg7: memref<1x512xf32, #tpu.memory_space<vmem>>, %arg8: memref<512x128xf32, #tpu.memory_space<vmem>>, %arg9: memref<1x128xf32, #tpu.memory_space<vmem>>, %arg10: memref<1x128xf32, #tpu.memory_space<vmem>>, %arg11: memref<256x128xf32, #tpu.memory_space<vmem>>, %arg12: memref<1x128xf32, #tpu.memory_space<vmem>>, %arg13: memref<2x128xf32, #tpu.memory_space<vmem>>) attributes {dimension_semantics = [], scalar_prefetch = 0 : i64, scratch_operands = 0 : i64, tpu.core_type = #tpu.core_type<tc>} {
    %c0 = arith.constant 0 : index
    %c0_0 = arith.constant 0 : index
    %0 = vector.load %arg3[%c0, %c0_0] : memref<128x4xbf16, #tpu.memory_space<vmem>>, vector<128x4xbf16>
    %c0_1 = arith.constant 0 : index
    %c0_2 = arith.constant 0 : index
    %1 = vector.load %arg0[%c0_1, %c0_2] : memref<4x512xbf16, #tpu.memory_space<vmem>>, vector<4x512xbf16>
    %cst = arith.constant dense<0.000000e+00> : vector<128x512xf32>
    %2 = tpu.matmul %0, %1, %cst {dimension_numbers = #tpu.dot_dimension_numbers<[1], [0], [0], [1], [0, 0, 1, 1], [], []>} : vector<128x4xbf16>, vector<4x512xbf16>, vector<128x512xf32> -> vector<128x512xf32>
    %c0_3 = arith.constant 0 : index
    %c0_4 = arith.constant 0 : index
    %3 = vector.load %arg4[%c0_3, %c0_4] : memref<128x1xf32, #tpu.memory_space<vmem>>, vector<128x1xf32>
    %4 = vector.broadcast %3 : vector<128x1xf32> to vector<128x512xf32>
    %5 = arith.addf %2, %4 : vector<128x512xf32>
    %cst_5 = arith.constant 0.000000e+00 : f32
    %6 = vector.broadcast %cst_5 : f32 to vector<128x512xf32>
    %7 = arith.maximumf %5, %6 : vector<128x512xf32>
    %c0_6 = arith.constant 0 : index
    %c0_7 = arith.constant 0 : index
    %8 = vector.load %arg2[%c0_6, %c0_7] : memref<2x512xf32, #tpu.memory_space<vmem>>, vector<2x512xf32>
    %cst_8 = arith.constant dense<0.000000e+00> : vector<2x128xf32>
    %9 = tpu.matmul %8, %7, %cst_8 {dimension_numbers = #tpu.dot_dimension_numbers<[1], [1], [0], [0], [0, 0, 1, 0], [], []>} : vector<2x512xf32>, vector<128x512xf32>, vector<2x128xf32> -> vector<2x128xf32>
    %c0_9 = arith.constant 0 : index
    %c0_10 = arith.constant 0 : index
    %10 = vector.load %arg1[%c0_9, %c0_10] : memref<2x16xf32, #tpu.memory_space<vmem>>, vector<2x16xf32>
    %c0_11 = arith.constant 0 : index
    %c0_12 = arith.constant 0 : index
    %11 = vector.load %arg5[%c0_11, %c0_12] : memref<16x512xf32, #tpu.memory_space<vmem>>, vector<16x512xf32>
    %cst_13 = arith.constant dense<0.000000e+00> : vector<2x512xf32>
    %12 = tpu.matmul %10, %11, %cst_13 {dimension_numbers = #tpu.dot_dimension_numbers<[1], [0], [0], [1], [0, 0, 1, 1], [], []>} : vector<2x16xf32>, vector<16x512xf32>, vector<2x512xf32> -> vector<2x512xf32>
    %c0_14 = arith.constant 0 : index
    %c0_15 = arith.constant 0 : index
    %13 = vector.load %arg6[%c0_14, %c0_15] : memref<1x512xf32, #tpu.memory_space<vmem>>, vector<1x512xf32>
    %14 = vector.broadcast %13 : vector<1x512xf32> to vector<2x512xf32>
    %15 = arith.mulf %12, %14 : vector<2x512xf32>
    %c0_16 = arith.constant 0 : index
    %c0_17 = arith.constant 0 : index
    %16 = vector.load %arg7[%c0_16, %c0_17] : memref<1x512xf32, #tpu.memory_space<vmem>>, vector<1x512xf32>
    %17 = vector.broadcast %16 : vector<1x512xf32> to vector<2x512xf32>
    %18 = arith.addf %15, %17 : vector<2x512xf32>
    %19 = arith.negf %18 : vector<2x512xf32>
    %20 = math.exp %19 : vector<2x512xf32>
    %cst_18 = arith.constant 1.000000e+00 : f32
    %21 = vector.broadcast %cst_18 : f32 to vector<2x512xf32>
    %22 = arith.addf %21, %20 : vector<2x512xf32>
    %23 = arith.divf %21, %22 : vector<2x512xf32>
    %24 = arith.mulf %18, %23 : vector<2x512xf32>
    %c0_19 = arith.constant 0 : index
    %c0_20 = arith.constant 0 : index
    %25 = vector.load %arg8[%c0_19, %c0_20] : memref<512x128xf32, #tpu.memory_space<vmem>>, vector<512x128xf32>
    %cst_21 = arith.constant dense<0.000000e+00> : vector<2x128xf32>
    %26 = tpu.matmul %24, %25, %cst_21 {dimension_numbers = #tpu.dot_dimension_numbers<[1], [0], [0], [1], [0, 0, 1, 1], [], []>} : vector<2x512xf32>, vector<512x128xf32>, vector<2x128xf32> -> vector<2x128xf32>
    %c0_22 = arith.constant 0 : index
    %c0_23 = arith.constant 0 : index
    %27 = vector.load %arg9[%c0_22, %c0_23] : memref<1x128xf32, #tpu.memory_space<vmem>>, vector<1x128xf32>
    %28 = vector.broadcast %27 : vector<1x128xf32> to vector<2x128xf32>
    %29 = arith.mulf %26, %28 : vector<2x128xf32>
    %c0_24 = arith.constant 0 : index
    %c0_25 = arith.constant 0 : index
    %30 = vector.load %arg10[%c0_24, %c0_25] : memref<1x128xf32, #tpu.memory_space<vmem>>, vector<1x128xf32>
    %31 = vector.broadcast %30 : vector<1x128xf32> to vector<2x128xf32>
    %32 = arith.addf %29, %31 : vector<2x128xf32>
    %33 = arith.negf %32 : vector<2x128xf32>
    %34 = math.exp %33 : vector<2x128xf32>
    %cst_26 = arith.constant 1.000000e+00 : f32
    %35 = vector.broadcast %cst_26 : f32 to vector<2x128xf32>
    %36 = arith.addf %35, %34 : vector<2x128xf32>
    %37 = arith.divf %35, %36 : vector<2x128xf32>
    %38 = arith.mulf %32, %37 : vector<2x128xf32>
    %39 = tpu.concatenate %9, %38 in 1 : vector<2x128xf32>, vector<2x128xf32> -> vector<2x256xf32>
    %c0_27 = arith.constant 0 : index
    %c0_28 = arith.constant 0 : index
    %40 = vector.load %arg11[%c0_27, %c0_28] : memref<256x128xf32, #tpu.memory_space<vmem>>, vector<256x128xf32>
    %cst_29 = arith.constant dense<0.000000e+00> : vector<2x128xf32>
    %41 = tpu.matmul %39, %40, %cst_29 {dimension_numbers = #tpu.dot_dimension_numbers<[1], [0], [0], [1], [0, 0, 1, 1], [], []>} : vector<2x256xf32>, vector<256x128xf32>, vector<2x128xf32> -> vector<2x128xf32>
    %c0_30 = arith.constant 0 : index
    %c0_31 = arith.constant 0 : index
    %42 = vector.load %arg12[%c0_30, %c0_31] : memref<1x128xf32, #tpu.memory_space<vmem>>, vector<1x128xf32>
    %43 = vector.broadcast %42 : vector<1x128xf32> to vector<2x128xf32>
    %44 = arith.addf %41, %43 : vector<2x128xf32>
    %c0_32 = arith.constant 0 : index
    %c0_33 = arith.constant 0 : index
    %45 = vector.load %arg13[%c0_32, %c0_33] : memref<2x128xf32, #tpu.memory_space<vmem>>, vector<2x128xf32>
    tpu.vector_store %arg13[%c0_32, %c0_33], %44 {strides = array<i32>} : memref<2x128xf32, #tpu.memory_space<vmem>>, vector<2x128xf32>,
    return
  }
}

</mosaic_0001>

<bundles_post_ra>
// kernel: resnest_face_conditions_forward.1
= control target key start
LH: loop header
LB: loop body
LE: loop exit
PB: predicated region body
PF: predicated region fallthrough
CT: control target
= control target key end

     0   :  { %18 = vsyncpa [#allocation3], 0  ;;  %s2212_s0 = inlined_call_operand.vmem [shape: bf16[4,512], index: 0, kind: input, shape index: {}]   ;;  %s2213_s1 = inlined_call_operand.vmem [shape: f32[2,16], index: 1, kind: input, shape index: {}]   ;;  %s2214_s2 = inlined_call_operand.vmem [shape: f32[2,512], index: 2, kind: input, shape index: {}]   ;;  %s2215_s3 = inlined_call_operand.vmem [shape: bf16[128,4], index: 3, kind: input, shape index: {}]   ;;  %s2216_s4 = inlined_call_operand.vmem [shape: f32[128,1], index: 4, kind: input, shape index: {}]   ;;  %s2217_s5 = inlined_call_operand.hbm [shape: f32[16,512], index: 5, kind: input, shape index: {}]   ;;  %s2218_s6 = inlined_call_operand.vmem [shape: f32[1,512], index: 6, kind: input, shape index: {}]   ;;  %s2219_s7 = inlined_call_operand.vmem [shape: f32[1,512], index: 7, kind: input, shape index: {}]   ;;  %s2220_s8 = inlined_call_operand.vmem [shape: f32[512,128], index: 8, kind: input, shape index: {}]   ;;  %s2221_s9 = inlined_call_operand.vmem [shape: f32[1,128], index: 9, kind: input, shape index: {}]   ;;  %s2222_s10 = inlined_call_operand.vmem [shape: f32[1,128], index: 10, kind: input, shape index: {}]   ;;  %s2223_s11 = inlined_call_operand.hbm [shape: f32[256,128], index: 11, kind: input, shape index: {}]   ;;  %s2224_s12 = inlined_call_operand.vmem [shape: f32[1,128], index: 12, kind: input, shape index: {}]   ;;  %s2225_s13 = inlined_call_operand.hbm [shape: f32[2,128], index: 13, kind: output, shape index: {}]  }
   0x1   :  { %19 = vsyncpa [#allocation6], 0 }
   0x2   :  { %20 = vsyncpa [#allocation4], 0  ;;  %s1748_s25 = smov [#allocation2]   ;;  %s1676_s29 = scalar_lea.hbm %s2217_s5, 1024 }
   0x3   :  { %s36_s26 = sshll.u32 %s1748_s25, 4  ;;  %p1677_p0 = scmp.ne.s32.totalorder %s2217_s5, %s1676_s29  ;;  %s37_s26 = int_to_ptr.vmem [resolvable:$true] %s36_s26 }
   0x4   :  { %p1680_p1 = scmp.lt.u32.totalorder %s1676_s29, %s2217_s5 }
   0x6   :  { %p1682_p2 = pnand %p1680_p1, %p1677_p0 }
   0x8   :  { %1685 = shalt.err (!%p1682_p2)
}
   0x9   :  { %s1686_s17 = scalar_lea.vmem %s37_s26, 1024  ;;  %p1691_p4 = scmp.lt.s32.totalorder %s37_s26, %s37_s26 }
   0xa   :  { %p1687_p3 = scmp.ne.s32.totalorder %s37_s26, %s1686_s17  ;;  %p1692_p5 = scmp.lt.s32.totalorder %s1686_s17, %s1686_s17 }
   0xc   :  { %p1693_p6 = por %p1692_p5, %p1691_p4 }
   0xe   :  { %p1694_p7 = pnand %p1693_p6, %p1687_p3 }
  0x10   :  { %1697 = shalt.err (!%p1694_p7)
}
  0x11   :  { %s1749_s18 = smov 512   ;;  %s1750_s19 = smov 32  }
  0x12   :  { %42 = dma.hbm_to_vmem [thread:$0]  %s2217_s5, 1024, %s37_s26, [#allocation3], %s1749_s18, %s1749_s18, %s1750_s19  }
  0x13   :  { %s1751_s22 = smov [#allocation5]   ;;  %s1698_s27 = scalar_lea.hbm %s2223_s11, 4096 }
  0x14   :  { %s58_s23 = sshll.u32 %s1751_s22, 4  ;;  %p1699_p8 = scmp.ne.s32.totalorder %s2223_s11, %s1698_s27  ;;  %s59_s23 = int_to_ptr.vmem [resolvable:$true] %s58_s23 }
  0x15   :  { %p1702_p9 = scmp.lt.u32.totalorder %s1698_s27, %s2223_s11 }
  0x17   :  { %p1704_p10 = pnand %p1702_p9, %p1699_p8 }
  0x19   :  { %1707 = shalt.err (!%p1704_p10)
}
  0x1a   :  { %s1708_s15 = scalar_lea.vmem %s59_s23, 4096  ;;  %p1713_p12 = scmp.lt.s32.totalorder %s59_s23, %s59_s23 }
  0x1b   :  { %p1709_p11 = scmp.ne.s32.totalorder %s59_s23, %s1708_s15  ;;  %p1714_p13 = scmp.lt.s32.totalorder %s1708_s15, %s1708_s15 }
  0x1d   :  { %p1715_p0 = por %p1714_p13, %p1713_p12 }
  0x1f   :  { %p1716_p1 = pnand %p1715_p0, %p1709_p11 }
  0x21   :  { %1719 = shalt.err (!%p1716_p1)
}
  0x22   :  { %s1752_s5 = smov 128   ;;  %s1753_s26 = smov 8  }
  0x23   :  { %64 = dma.hbm_to_vmem [thread:$0]  %s2223_s11, 4096, %s59_s23, [#allocation6], %s1752_s5, %s1752_s5, %s1753_s26  }
  0x24   :  { %1742 = dma.done.wait [#allocation3], 1024  }
  0x25   :  { %1743 = vsyncadd [#allocation3], 4294966272 }
  0x26   :  { %1744 = dma.done.wait [#allocation6], 4096  }
  0x27   :  { %1745 = vsyncadd [#allocation6], 4294963200  ;;  %v232_v0 = vlaneseq  ;;  %v1754_v1 = vmov 1983009808   ;;  %v1755_v3 = vmov 0   ;;  %v90_v7 = vld [vmem:[%s2212_s0] sm:$0xff] }
  0x28   :  { %v230_v2 = vunpack.c.l.s4 %v1754_v1  ;;  %315 = vmatprep.mubr.bf16.mxu0 %v1755_v3  ;;  %428 = vmatprep.mubr.bf16.mxu1 %v1755_v3  ;;  %vm270_vm0 = vcmask 1041408   ;;  %v228_v9 = vcombine.high %v90_v7, %v90_v7  ;;  %v1647_v15 = vld [vmem:[%s2215_s3] sm:$0xff]   ;;  %vm245_vm1 = vcmask 31744   ;;  %v92_v17 = vld [vmem:[%s2216_s4 + $0x8] sm:$0xff]  ;;  %v93_v18 = vld [vmem:[%s2216_s4 + $0x10] sm:$0xff]  ;;  %s1757_s21 = smov [#allocation7]  }
  0x29   :  { %v1854_v4 = vshrl.u32 %v232_v0, 7  ;;  %1644 = vset.pattern.permute.xlu0 %v1755_v3  ;;  %1645 = vset.pattern.permute.xlu1 %v1755_v3  ;;  %v91_v16 = vld [vmem:[%s2216_s4] sm:$0xff]  ;;  %v94_v19 = vld [vmem:[%s2216_s4 + $0x18] sm:$0xff]  ;;  %v1648_v20 = vld [vmem:[%s2215_s3 + $0x8] sm:$0xff]   ;;  %vm745_vm2 = vcmask 130048  }
  0x2a   :  { %v231_v5 = vunpack.c.0.s8 %v230_v2  ;;  %109 = vperm.xlu0 %1644, %v91_v16   ;;  %119 = vperm.xlu1 %1645, %v93_v18   ;;  %v95_v21 = vld [vmem:[%s2216_s4 + $0x20] sm:$0xff]  ;;  %v96_v22 = vld [vmem:[%s2216_s4 + $0x28] sm:$0xff]  ;;  %v97_v23 = vld [vmem:[%s2216_s4 + $0x30] sm:$0xff] }
  0x2b   :  { %v98_v24 = vld [vmem:[%s2216_s4 + $0x38] sm:$0xff]  ;;  %v1649_v25 = vld [vmem:[%s2215_s3 + $0x10] sm:$0xff]   ;;  %v99_v26 = vld [vmem:[%s2216_s4 + $0x40] sm:$0xff] }
  0x2c   :  { %v1859_v6 = vsub.s32 %v231_v5, %v1854_v4  ;;  %v100_v27 = vld [vmem:[%s2216_s4 + $0x48] sm:$0xff]  ;;  %v101_v28 = vld [vmem:[%s2216_s4 + $0x50] sm:$0xff]  ;;  %v102_v29 = vld [vmem:[%s2216_s4 + $0x58] sm:$0xff] }
  0x2d   :  { %v1650_v30 = vld [vmem:[%s2215_s3 + $0x18] sm:$0xff]   ;;  %v103_v31 = vld [vmem:[%s2216_s4 + $0x60] sm:$0xff]  ;;  %v104_v32 = vld [vmem:[%s2216_s4 + $0x68] sm:$0xff] }
  0x2e   :  { %v235_v8 = vrot.slane %v90_v7, %v1859_v6  ;;  %v242_v12 = vrot.slane %v228_v9, %v1859_v6  ;;  %114 = vperm.xlu0 %1644, %v92_v17   ;;  %124 = vperm.xlu1 %1645, %v94_v19   ;;  %v105_v33 = vld [vmem:[%s2216_s4 + $0x70] sm:$0xff]  ;;  %v106_v34 = vld [vmem:[%s2216_s4 + $0x78] sm:$0xff]  ;;  %v1651_v35 = vld [vmem:[%s2215_s3 + $0x20] sm:$0xff]  }
  0x2f   :  { %v1652_v36 = vld [vmem:[%s2215_s3 + $0x28] sm:$0xff]   ;;  %v1653_v37 = vld [vmem:[%s2215_s3 + $0x30] sm:$0xff]   ;;  %v1654_v38 = vld [vmem:[%s2215_s3 + $0x38] sm:$0xff]  }
  0x30   :  { %v243_v10 = vcombine.high %v235_v8, %v235_v8  ;;  %v272_v11 = vsel %vm270_vm0, %v235_v8, 0  ;;  %v244_v13 = vcombine.high %v242_v12, %v242_v12  ;;  %v278_v14 = vsel %vm270_vm0, %v242_v12, 0  ;;  %v573_v39 = vld [vmem:[%s2214_s2] sm:$0xff] }
  0x31   :  { %v1972_v40 = vrot.slane %v573_v39, %v1859_v6  ;;  %v575_v41 = vcombine.high %v573_v39, %v573_v39 }
  0x32   :  { %1332 = vmatprep.subr.msk.bf16.mxu0 %vm270_vm0, %v243_v10  ;;  %1341 = vmatprep.subr.msk.bf16.mxu1 %vm270_vm0, %v244_v13 }
  0x33   :  { %284 = vmatpush1.bf16.msra.mxu0 %v272_v11  ;;  %397 = vmatpush1.bf16.msra.mxu1 %v278_v14  ;;  %v590_v42 = vcombine.high %v1972_v40, %v1972_v40  ;;  %v1977_v43 = vrot.slane %v575_v41, %v1859_v6 }
  0x34   :  { %129 = vperm.xlu0 %1644, %v95_v21   ;;  %134 = vperm.xlu1 %1645, %v96_v22  }
  0x35   :  { %v591_v44 = vcombine.high %v1977_v43, %v1977_v43 }
  0x36   :  { %1333 = vmatmul.mubr.msk.bf16.vlgmr.msra.gmra.mrb[0].mxu0 %vm245_vm1, %v1647_v15  ;;  %1342 = vmatmul.mubr.msk.bf16.vlgmr.msra.gmra.mrb[0].mxu1 %vm245_vm1, %v1647_v15 }
  0x37   :  { %325 = vmatprep.mubr.bf16.mxu0 %v1755_v3  ;;  %438 = vmatprep.mubr.bf16.mxu1 %v1755_v3 }
  0x38   :  { %139 = vperm.xlu0 %1644, %v97_v23   ;;  %144 = vperm.xlu1 %1645, %v98_v24  }
  0x3c   :  { %149 = vperm.xlu0 %1644, %v99_v26   ;;  %154 = vperm.xlu1 %1645, %v100_v27  }
  0x3e   :  { %1334 = vmatmul.mubr.msk.bf16.gmra.mrb[4].mxu0 %vm245_vm1, %v1648_v20  ;;  %1343 = vmatmul.mubr.msk.bf16.gmra.mrb[4].mxu1 %vm245_vm1, %v1648_v20 }
  0x3f   :  { %335 = vmatprep.mubr.bf16.mxu0 %v1755_v3  ;;  %448 = vmatprep.mubr.bf16.mxu1 %v1755_v3 }
  0x40   :  { %159 = vperm.xlu0 %1644, %v101_v28   ;;  %164 = vperm.xlu1 %1645, %v102_v29  }
  0x44   :  { %169 = vperm.xlu0 %1644, %v103_v31   ;;  %174 = vperm.xlu1 %1645, %v104_v32  }
  0x46   :  { %1335 = vmatmul.mubr.msk.bf16.gmra.mrb[8].mxu0 %vm245_vm1, %v1649_v25  ;;  %1344 = vmatmul.mubr.msk.bf16.gmra.mrb[8].mxu1 %vm245_vm1, %v1649_v25 }
  0x47   :  { %345 = vmatprep.mubr.bf16.mxu0 %v1755_v3  ;;  %458 = vmatprep.mubr.bf16.mxu1 %v1755_v3 }
  0x48   :  { %179 = vperm.xlu0 %1644, %v105_v33   ;;  %184 = vperm.xlu1 %1645, %v106_v34  }
  0x4e   :  { %1336 = vmatmul.mubr.msk.bf16.gmra.mrb[12].mxu0 %vm245_vm1, %v1650_v30  ;;  %1345 = vmatmul.mubr.msk.bf16.gmra.mrb[12].mxu1 %vm245_vm1, %v1650_v30 }
  0x4f   :  { %355 = vmatprep.mubr.bf16.mxu0 %v1755_v3  ;;  %468 = vmatprep.mubr.bf16.mxu1 %v1755_v3 }
  0x56   :  { %1337 = vmatmul.mubr.msk.bf16.gmra.mrb[16].mxu0 %vm245_vm1, %v1651_v35  ;;  %1346 = vmatmul.mubr.msk.bf16.gmra.mrb[16].mxu1 %vm245_vm1, %v1651_v35 }
  0x57   :  { %365 = vmatprep.mubr.bf16.mxu0 %v1755_v3  ;;  %478 = vmatprep.mubr.bf16.mxu1 %v1755_v3 }
  0x5e   :  { %1338 = vmatmul.mubr.msk.bf16.gmra.mrb[20].mxu0 %vm245_vm1, %v1652_v36  ;;  %1347 = vmatmul.mubr.msk.bf16.gmra.mrb[20].mxu1 %vm245_vm1, %v1652_v36 }
  0x5f   :  { %375 = vmatprep.mubr.bf16.mxu0 %v1755_v3  ;;  %488 = vmatprep.mubr.bf16.mxu1 %v1755_v3 }
  0x66   :  { %1339 = vmatmul.mubr.msk.bf16.gmra.mrb[24].mxu0 %vm245_vm1, %v1653_v37  ;;  %1348 = vmatmul.mubr.msk.bf16.gmra.mrb[24].mxu1 %vm245_vm1, %v1653_v37 }
  0x67   :  { %385 = vmatprep.mubr.bf16.mxu0 %v1755_v3  ;;  %498 = vmatprep.mubr.bf16.mxu1 %v1755_v3 }
  0x6e   :  { %1340 = vmatmul.mubr.msk.bf16.gmra.mrb[28].mxu0 %vm245_vm1, %v1654_v38  ;;  %1349 = vmatmul.mubr.msk.bf16.gmra.mrb[28].mxu1 %vm245_vm1, %v1654_v38 }
  0x6f   :  { %660 = vmatprep.mubr.f32.mxu1 %v590_v42  ;;  %730 = vmatprep.mubr.f32.mxu0 %v591_v44 }
  0xa9   :  { %v110_v45 = vpop.permute.xlu0 %109  ;;  %v120_v46 = vpop.permute.xlu1 %119 }
  0xad   :  { %v115_v48 = vpop.permute.xlu0 %114  ;;  %v125_v12 = vpop.permute.xlu1 %124 }
  0xb3   :  { %v130_v37 = vpop.permute.xlu0 %129  ;;  %v135_v44 = vpop.permute.xlu1 %134 }
 0x109   :  { %v317_v47 = vpop.f32.mrb[0].mxu0  ;;  %v430_v53 = vpop.f32.mrb[0].mxu1 }
 0x10a   :  { %v318_v49 = vadd.f32 %v317_v47, %v110_v45  ;;  %v319_v50 = vpop.f32.mrb[1].mxu0  ;;  %v431_v55 = vadd.f32 %v430_v53, %v110_v45  ;;  %v432_v57 = vpop.f32.mrb[1].mxu1 }
 0x10b   :  { %v320_v51 = vadd.f32 %v319_v50, %v110_v45  ;;  %v321_v52 = vpop.f32.mrb[2].mxu0  ;;  %v433_v59 = vadd.f32 %v432_v57, %v110_v45  ;;  %v434_v60 = vpop.f32.mrb[2].mxu1 }
 0x10c   :  { %v322_v54 = vadd.f32 %v321_v52, %v115_v48  ;;  %v323_v56 = vpop.f32.mrb[3].mxu0  ;;  %v509_v61 = vmax.f32 %v318_v49, 0.0  ;;  %v435_v63 = vadd.f32 %v434_v60, %v115_v48  ;;  %v436_v0 = vpop.f32.mrb[3].mxu1  ;;  %v511_v6 = vmax.f32 %v431_v55, 0.0 }
 0x10d   :  { %v324_v58 = vadd.f32 %v323_v56, %v115_v48  ;;  %v510_v1 = vmax.f32 %v320_v51, 0.0  ;;  %v437_v3 = vadd.f32 %v436_v0, %v115_v48  ;;  %v512_v9 = vmax.f32 %v433_v59, 0.0 }
 0x10e   :  { %v513_v62 = vmax.f32 %v322_v54, 0.0  ;;  %v515_v7 = vmax.f32 %v435_v63, 0.0 }
 0x10f   :  { %v514_v2 = vmax.f32 %v324_v58, 0.0  ;;  %v516_v10 = vmax.f32 %v437_v3, 0.0 }
 0x110   :  { %v1467_v5 = vpack.c.bf16 %v513_v62, %v509_v61  ;;  %v1499_v13 = vpack.c.bf16 %v515_v7, %v511_v6  ;;  %v140_v6 = vpop.permute.xlu0 %139 }
 0x111   :  { %v1465_v8 = vpack.c.bf16 %v514_v2, %v510_v1  ;;  %v327_v11 = vpop.f32.mrb[4].mxu0  ;;  %v1497_v16 = vpack.c.bf16 %v516_v10, %v512_v9  ;;  %v440_v19 = vpop.f32.mrb[4].mxu1 }
 0x112   :  { %v328_v14 = vadd.f32 %v327_v11, %v120_v46  ;;  %v329_v15 = vpop.f32.mrb[5].mxu0  ;;  %v441_v21 = vadd.f32 %v440_v19, %v120_v46  ;;  %v442_v23 = vpop.f32.mrb[5].mxu1 }
 0x113   :  { %v330_v17 = vadd.f32 %v329_v15, %v120_v46  ;;  %v331_v18 = vpop.f32.mrb[6].mxu0  ;;  %1466 = vmatprep.subr.bf16.mxu1 %v1465_v8  ;;  %v443_v25 = vadd.f32 %v442_v23, %v120_v46  ;;  %v444_v26 = vpop.f32.mrb[6].mxu1  ;;  %1498 = vmatprep.subr.bf16.mxu0 %v1497_v16 }
 0x114   :  { %v332_v20 = vadd.f32 %v331_v18, %v125_v12  ;;  %v333_v22 = vpop.f32.mrb[7].mxu0  ;;  %1468 = vmatpush1.bf16.xpose.msra.mxu1 %v1467_v5  ;;  %v517_v27 = vmax.f32 %v328_v14, 0.0  ;;  %v445_v29 = vadd.f32 %v444_v26, %v125_v12  ;;  %v446_v30 = vpop.f32.mrb[7].mxu1  ;;  %1500 = vmatpush1.bf16.xpose.msra.mxu0 %v1499_v13  ;;  %v519_v35 = vmax.f32 %v441_v21, 0.0 }
 0x115   :  { %v334_v24 = vadd.f32 %v333_v22, %v125_v12  ;;  %v518_v31 = vmax.f32 %v330_v17, 0.0  ;;  %v447_v33 = vadd.f32 %v446_v30, %v125_v12  ;;  %v520_v39 = vmax.f32 %v443_v25, 0.0  ;;  %v145_v11 = vpop.permute.xlu1 %144 }
 0x116   :  { %v521_v28 = vmax.f32 %v332_v20, 0.0  ;;  %v523_v36 = vmax.f32 %v445_v29, 0.0 }
 0x117   :  { %v522_v32 = vmax.f32 %v334_v24, 0.0  ;;  %v524_v41 = vmax.f32 %v447_v33, 0.0 }
 0x118   :  { %v1471_v34 = vpack.c.bf16 %v521_v28, %v517_v27  ;;  %v1503_v45 = vpack.c.bf16 %v523_v36, %v519_v35  ;;  %v150_v36 = vpop.permute.xlu0 %149 }
 0x119   :  { %v1469_v38 = vpack.c.bf16 %v522_v32, %v518_v31  ;;  %v337_v42 = vpop.f32.mrb[8].mxu0  ;;  %v1501_v48 = vpack.c.bf16 %v524_v41, %v520_v39  ;;  %v450_v51 = vpop.f32.mrb[8].mxu1 }
 0x11a   :  { %v338_v46 = vadd.f32 %v337_v42, %v130_v37  ;;  %v339_v47 = vpop.f32.mrb[9].mxu0  ;;  %v451_v53 = vadd.f32 %v450_v51, %v130_v37  ;;  %v452_v55 = vpop.f32.mrb[9].mxu1 }
 0x11b   :  { %v340_v49 = vadd.f32 %v339_v47, %v130_v37  ;;  %v341_v50 = vpop.f32.mrb[10].mxu0  ;;  %1470 = vmatprep.subr.bf16.mxu1 %v1469_v38  ;;  %v453_v57 = vadd.f32 %v452_v55, %v130_v37  ;;  %v454_v58 = vpop.f32.mrb[10].mxu1  ;;  %1502 = vmatprep.subr.bf16.mxu0 %v1501_v48 }
 0x11c   :  { %v342_v52 = vadd.f32 %v341_v50, %v135_v44  ;;  %v343_v54 = vpop.f32.mrb[11].mxu0  ;;  %1472 = vmatpush1.bf16.xpose.msra.mxu1 %v1471_v34  ;;  %v525_v59 = vmax.f32 %v338_v46, 0.0  ;;  %v455_v61 = vadd.f32 %v454_v58, %v135_v44  ;;  %v456_v62 = vpop.f32.mrb[11].mxu1  ;;  %1504 = vmatpush1.bf16.xpose.msra.mxu0 %v1503_v45  ;;  %v527_v3 = vmax.f32 %v451_v53, 0.0 }
 0x11d   :  { %v344_v56 = vadd.f32 %v343_v54, %v135_v44  ;;  %v526_v63 = vmax.f32 %v340_v49, 0.0  ;;  %v457_v1 = vadd.f32 %v456_v62, %v135_v44  ;;  %v528_v8 = vmax.f32 %v453_v57, 0.0  ;;  %v155_v42 = vpop.permute.xlu1 %154 }
 0x11e   :  { %v529_v60 = vmax.f32 %v342_v52, 0.0  ;;  %v531_v5 = vmax.f32 %v455_v61, 0.0 }
 0x11f   :  { %v530_v0 = vmax.f32 %v344_v56, 0.0  ;;  %v532_v9 = vmax.f32 %v457_v1, 0.0 }
 0x120   :  { %v1475_v2 = vpack.c.bf16 %v529_v60, %v525_v59  ;;  %v1507_v12 = vpack.c.bf16 %v531_v5, %v527_v3  ;;  %v160_v5 = vpop.permute.xlu0 %159 }
 0x121   :  { %v1473_v7 = vpack.c.bf16 %v530_v0, %v526_v63  ;;  %v347_v10 = vpop.f32.mrb[12].mxu0  ;;  %v1505_v15 = vpack.c.bf16 %v532_v9, %v528_v8  ;;  %v460_v18 = vpop.f32.mrb[12].mxu1 }
 0x122   :  { %v348_v13 = vadd.f32 %v347_v10, %v140_v6  ;;  %v349_v14 = vpop.f32.mrb[13].mxu0  ;;  %v461_v20 = vadd.f32 %v460_v18, %v140_v6  ;;  %v462_v22 = vpop.f32.mrb[13].mxu1 }
 0x123   :  { %v350_v16 = vadd.f32 %v349_v14, %v140_v6  ;;  %v351_v17 = vpop.f32.mrb[14].mxu0  ;;  %1474 = vmatprep.subr.bf16.mxu1 %v1473_v7  ;;  %v463_v24 = vadd.f32 %v462_v22, %v140_v6  ;;  %v464_v25 = vpop.f32.mrb[14].mxu1  ;;  %1506 = vmatprep.subr.bf16.mxu0 %v1505_v15 }
 0x124   :  { %v352_v19 = vadd.f32 %v351_v17, %v145_v11  ;;  %v353_v21 = vpop.f32.mrb[15].mxu0  ;;  %1476 = vmatpush1.bf16.xpose.msra.mxu1 %v1475_v2  ;;  %v533_v26 = vmax.f32 %v348_v13, 0.0  ;;  %v465_v28 = vadd.f32 %v464_v25, %v145_v11  ;;  %v466_v29 = vpop.f32.mrb[15].mxu1  ;;  %1508 = vmatpush1.bf16.xpose.msra.mxu0 %v1507_v12  ;;  %v535_v34 = vmax.f32 %v461_v20, 0.0 }
 0x125   :  { %v354_v23 = vadd.f32 %v353_v21, %v145_v11  ;;  %v534_v30 = vmax.f32 %v350_v16, 0.0  ;;  %v467_v32 = vadd.f32 %v466_v29, %v145_v11  ;;  %v536_v38 = vmax.f32 %v463_v24, 0.0  ;;  %v165_v10 = vpop.permute.xlu1 %164 }
 0x126   :  { %v537_v27 = vmax.f32 %v352_v19, 0.0  ;;  %v539_v35 = vmax.f32 %v465_v28, 0.0 }
 0x127   :  { %v538_v31 = vmax.f32 %v354_v23, 0.0  ;;  %v540_v39 = vmax.f32 %v467_v32, 0.0 }
 0x128   :  { %v1479_v33 = vpack.c.bf16 %v537_v27, %v533_v26  ;;  %v1511_v44 = vpack.c.bf16 %v539_v35, %v535_v34  ;;  %v170_v35 = vpop.permute.xlu0 %169 }
 0x129   :  { %v1477_v37 = vpack.c.bf16 %v538_v31, %v534_v30  ;;  %v357_v41 = vpop.f32.mrb[16].mxu0  ;;  %v1509_v47 = vpack.c.bf16 %v540_v39, %v536_v38  ;;  %v470_v50 = vpop.f32.mrb[16].mxu1 }
 0x12a   :  { %v358_v45 = vadd.f32 %v357_v41, %v150_v36  ;;  %v359_v46 = vpop.f32.mrb[17].mxu0  ;;  %v471_v52 = vadd.f32 %v470_v50, %v150_v36  ;;  %v472_v54 = vpop.f32.mrb[17].mxu1 }
 0x12b   :  { %v360_v48 = vadd.f32 %v359_v46, %v150_v36  ;;  %v361_v49 = vpop.f32.mrb[18].mxu0  ;;  %1478 = vmatprep.subr.bf16.mxu1 %v1477_v37  ;;  %v473_v56 = vadd.f32 %v472_v54, %v150_v36  ;;  %v474_v57 = vpop.f32.mrb[18].mxu1  ;;  %1510 = vmatprep.subr.bf16.mxu0 %v1509_v47 }
 0x12c   :  { %v362_v51 = vadd.f32 %v361_v49, %v155_v42  ;;  %v363_v53 = vpop.f32.mrb[19].mxu0  ;;  %1480 = vmatpush1.bf16.xpose.msra.mxu1 %v1479_v33  ;;  %v541_v58 = vmax.f32 %v358_v45, 0.0  ;;  %v475_v60 = vadd.f32 %v474_v57, %v155_v42  ;;  %v476_v61 = vpop.f32.mrb[19].mxu1  ;;  %1512 = vmatpush1.bf16.xpose.msra.mxu0 %v1511_v44  ;;  %v543_v2 = vmax.f32 %v471_v52, 0.0 }
 0x12d   :  { %v364_v55 = vadd.f32 %v363_v53, %v155_v42  ;;  %v542_v62 = vmax.f32 %v360_v48, 0.0  ;;  %v477_v0 = vadd.f32 %v476_v61, %v155_v42  ;;  %v544_v7 = vmax.f32 %v473_v56, 0.0  ;;  %v175_v41 = vpop.permute.xlu1 %174 }
 0x12e   :  { %v545_v59 = vmax.f32 %v362_v51, 0.0  ;;  %v547_v3 = vmax.f32 %v475_v60, 0.0 }
 0x12f   :  { %v546_v63 = vmax.f32 %v364_v55, 0.0  ;;  %v548_v8 = vmax.f32 %v477_v0, 0.0 }
 0x130   :  { %v1483_v1 = vpack.c.bf16 %v545_v59, %v541_v58  ;;  %v1515_v11 = vpack.c.bf16 %v547_v3, %v543_v2  ;;  %v180_v3 = vpop.permute.xlu0 %179 }
 0x131   :  { %v1481_v6 = vpack.c.bf16 %v546_v63, %v542_v62  ;;  %v367_v9 = vpop.f32.mrb[20].mxu0  ;;  %v1513_v14 = vpack.c.bf16 %v548_v8, %v544_v7  ;;  %v480_v17 = vpop.f32.mrb[20].mxu1 }
 0x132   :  { %v368_v12 = vadd.f32 %v367_v9, %v160_v5  ;;  %v369_v13 = vpop.f32.mrb[21].mxu0  ;;  %v481_v19 = vadd.f32 %v480_v17, %v160_v5  ;;  %v482_v21 = vpop.f32.mrb[21].mxu1 }
 0x133   :  { %v370_v15 = vadd.f32 %v369_v13, %v160_v5  ;;  %v371_v16 = vpop.f32.mrb[22].mxu0  ;;  %1482 = vmatprep.subr.bf16.mxu1 %v1481_v6  ;;  %v483_v23 = vadd.f32 %v482_v21, %v160_v5  ;;  %v484_v24 = vpop.f32.mrb[22].mxu1  ;;  %1514 = vmatprep.subr.bf16.mxu0 %v1513_v14 }
 0x134   :  { %v372_v18 = vadd.f32 %v371_v16, %v165_v10  ;;  %v373_v20 = vpop.f32.mrb[23].mxu0  ;;  %1484 = vmatpush1.bf16.xpose.msra.mxu1 %v1483_v1  ;;  %v549_v25 = vmax.f32 %v368_v12, 0.0  ;;  %v485_v27 = vadd.f32 %v484_v24, %v165_v10  ;;  %v486_v28 = vpop.f32.mrb[23].mxu1  ;;  %1516 = vmatpush1.bf16.xpose.msra.mxu0 %v1515_v11  ;;  %v551_v33 = vmax.f32 %v481_v19, 0.0 }
 0x135   :  { %v374_v22 = vadd.f32 %v373_v20, %v165_v10  ;;  %v550_v29 = vmax.f32 %v370_v15, 0.0  ;;  %v487_v31 = vadd.f32 %v486_v28, %v165_v10  ;;  %v552_v37 = vmax.f32 %v483_v23, 0.0  ;;  %v185_v9 = vpop.permute.xlu1 %184  ;;  %v738_v28 = vld [vmem:[#allocation2 + $0x8] sm:$0xff] }
 0x136   :  { %v553_v26 = vmax.f32 %v372_v18, 0.0  ;;  %v555_v34 = vmax.f32 %v485_v27, 0.0 }
 0x137   :  { %v554_v30 = vmax.f32 %v374_v22, 0.0  ;;  %v556_v38 = vmax.f32 %v487_v31, 0.0 }
 0x138   :  { %v1487_v32 = vpack.c.bf16 %v553_v26, %v549_v25  ;;  %v1519_v42 = vpack.c.bf16 %v555_v34, %v551_v33 }
 0x139   :  { %v1485_v36 = vpack.c.bf16 %v554_v30, %v550_v29  ;;  %v377_v39 = vpop.f32.mrb[24].mxu0  ;;  %v1517_v46 = vpack.c.bf16 %v556_v38, %v552_v37  ;;  %v490_v49 = vpop.f32.mrb[24].mxu1  ;;  %v742_v29 = vld [vmem:[#allocation2 + $0x28] sm:$0xff] }
 0x13a   :  { %v378_v44 = vadd.f32 %v377_v39, %v170_v35  ;;  %v379_v45 = vpop.f32.mrb[25].mxu0  ;;  %v491_v51 = vadd.f32 %v490_v49, %v170_v35  ;;  %v492_v53 = vpop.f32.mrb[25].mxu1  ;;  %v1529_v39 = vpack.c.bf16 %v742_v29, %v738_v28  ;;  %v1007_v29 = vld [vmem:[%s2220_s8 + $0x120] sm:$0xff] }
 0x13b   :  { %v380_v47 = vadd.f32 %v379_v45, %v170_v35  ;;  %v381_v48 = vpop.f32.mrb[26].mxu0  ;;  %1486 = vmatprep.subr.bf16.mxu1 %v1485_v36  ;;  %v493_v55 = vadd.f32 %v492_v53, %v170_v35  ;;  %v494_v56 = vpop.f32.mrb[26].mxu1  ;;  %1518 = vmatprep.subr.bf16.mxu0 %v1517_v46  ;;  %v741_v45 = vld [vmem:[#allocation2 + $0x20] sm:$0xff]  ;;  %v740_v46 = vld [vmem:[#allocation2 + $0x18] sm:$0xff] }
 0x13c   :  { %v382_v50 = vadd.f32 %v381_v48, %v175_v41  ;;  %v383_v52 = vpop.f32.mrb[27].mxu0  ;;  %1488 = vmatpush1.bf16.xpose.msra.mxu1 %v1487_v32  ;;  %v557_v57 = vmax.f32 %v378_v44, 0.0  ;;  %v495_v59 = vadd.f32 %v494_v56, %v175_v41  ;;  %v496_v60 = vpop.f32.mrb[27].mxu1  ;;  %1520 = vmatpush1.bf16.xpose.msra.mxu0 %v1519_v42  ;;  %v559_v1 = vmax.f32 %v491_v51, 0.0  ;;  %v737_v44 = vld [vmem:[#allocation2] sm:$0xff]  ;;  %v743_v51 = vld [vmem:[#allocation2 + $0x30] sm:$0xff] }
 0x13d   :  { %v384_v54 = vadd.f32 %v383_v52, %v175_v41  ;;  %v558_v61 = vmax.f32 %v380_v47, 0.0  ;;  %v497_v63 = vadd.f32 %v496_v60, %v175_v41  ;;  %v560_v6 = vmax.f32 %v493_v55, 0.0  ;;  %v744_v47 = vld [vmem:[#allocation2 + $0x38] sm:$0xff]  ;;  %v736_v53 = vld [vmem:[%s2213_s1] sm:$0x3]  ;;  %v988_v55 = vld [vmem:[%s2220_s8 + $0x88] sm:$0xff] }
 0x13e   :  { %v561_v58 = vmax.f32 %v382_v50, 0.0  ;;  %v563_v2 = vmax.f32 %v495_v59, 0.0  ;;  %v1531_v48 = vpack.c.bf16 %v741_v45, %v737_v44  ;;  %v1533_v49 = vpack.c.bf16 %v744_v47, %v740_v46  ;;  %v739_v50 = vld [vmem:[#allocation2 + $0x10] sm:$0xff]  ;;  %v990_v60 = vld [vmem:[%s2220_s8 + $0x98] sm:$0xff] }
 0x13f   :  { %v562_v62 = vmax.f32 %v384_v54, 0.0  ;;  %v564_v7 = vmax.f32 %v497_v63, 0.0  ;;  %v1756_v52 = vmov 0.0   ;;  %v1535_v54 = vpack.c.bf16 %v743_v51, %v739_v50  ;;  %v989_v59 = vld [vmem:[%s2220_s8 + $0x90] sm:$0xff]  ;;  %v1020_v63 = vld [vmem:[%s2220_s8 + $0x188] sm:$0xff]  ;;  %v1010_v44 = vld [vmem:[%s2220_s8 + $0x138] sm:$0xff] }
 0x140   :  { %v1491_v0 = vpack.c.bf16 %v561_v58, %v557_v57  ;;  %v1523_v10 = vpack.c.bf16 %v563_v2, %v559_v1  ;;  %v971_v57 = vld [vmem:[%s2220_s8] sm:$0xff]  ;;  %v974_v1 = vld [vmem:[%s2220_s8 + $0x18] sm:$0xff]  ;;  %v997_v46 = vld [vmem:[%s2220_s8 + $0xd0] sm:$0xff] }
 0x141   :  { %v1489_v5 = vpack.c.bf16 %v562_v62, %v558_v61  ;;  %v387_v8 = vpop.f32.mrb[28].mxu0  ;;  %v1521_v13 = vpack.c.bf16 %v564_v7, %v560_v6  ;;  %v500_v16 = vpop.f32.mrb[28].mxu1  ;;  %v1019_v61 = vld [vmem:[%s2220_s8 + $0x180] sm:$0xff]  ;;  %v1541_v62 = vpack.c.bf16 %v990_v60, %v989_v59  ;;  %v1004_v6 = vld [vmem:[%s2220_s8 + $0x108] sm:$0xff]  ;;  %v998_v47 = vld [vmem:[%s2220_s8 + $0xd8] sm:$0xff] }
 0x142   :  { %v388_v11 = vadd.f32 %v387_v8, %v180_v3  ;;  %v389_v12 = vpop.f32.mrb[29].mxu0  ;;  %v501_v18 = vadd.f32 %v500_v16, %v180_v3  ;;  %v502_v20 = vpop.f32.mrb[29].mxu1  ;;  %v1569_v2 = vpack.c.bf16 %v1020_v63, %v1019_v61  ;;  %v991_v8 = vld [vmem:[%s2220_s8 + $0xa0] sm:$0xff]  ;;  %v1028_v50 = vld [vmem:[%s2220_s8 + $0x1c8] sm:$0xff]  ;;  %v981_v51 = vld [vmem:[%s2220_s8 + $0x50] sm:$0xff] }
 0x143   :  { %v390_v14 = vadd.f32 %v389_v12, %v180_v3  ;;  %v391_v15 = vpop.f32.mrb[30].mxu0  ;;  %1490 = vmatprep.subr.bf16.mxu1 %v1489_v5  ;;  %v503_v22 = vadd.f32 %v502_v20, %v180_v3  ;;  %v504_v23 = vpop.f32.mrb[30].mxu1  ;;  %1522 = vmatprep.subr.bf16.mxu0 %v1521_v13  ;;  %v1003_v5 = vld [vmem:[%s2220_s8 + $0x100] sm:$0xff]  ;;  %v1022_v12 = vld [vmem:[%s2220_s8 + $0x198] sm:$0xff]  ;;  %v993_v20 = vld [vmem:[%s2220_s8 + $0xb0] sm:$0xff] }
 0x144   :  { %v392_v17 = vadd.f32 %v391_v15, %v185_v9  ;;  %v393_v19 = vpop.f32.mrb[31].mxu0  ;;  %1492 = vmatpush1.bf16.xpose.msra.mxu1 %v1491_v0  ;;  %v565_v24 = vmax.f32 %v388_v11, 0.0  ;;  %v505_v26 = vadd.f32 %v504_v23, %v185_v9  ;;  %v506_v27 = vpop.f32.mrb[31].mxu1  ;;  %1524 = vmatpush1.bf16.xpose.msra.mxu0 %v1523_v10  ;;  %v567_v34 = vmax.f32 %v501_v18, 0.0  ;;  %v973_v0 = vld [vmem:[%s2220_s8 + $0x10] sm:$0xff]  ;;  %v975_v13 = vld [vmem:[%s2220_s8 + $0x20] sm:$0xff] }
 0x145   :  { %v394_v21 = vadd.f32 %v393_v19, %v185_v9  ;;  %v566_v30 = vmax.f32 %v390_v14, 0.0  ;;  %v507_v32 = vadd.f32 %v506_v27, %v185_v9  ;;  %v568_v37 = vmax.f32 %v503_v22, 0.0  ;;  %v992_v9 = vld [vmem:[%s2220_s8 + $0xa8] sm:$0xff]  ;;  %v1021_v10 = vld [vmem:[%s2220_s8 + $0x190] sm:$0xff]  ;;  %v1006_v18 = vld [vmem:[%s2220_s8 + $0x118] sm:$0xff] }
 0x146   :  { %v569_v25 = vmax.f32 %v392_v17, 0.0  ;;  %v571_v35 = vmax.f32 %v505_v26, 0.0  ;;  %v1543_v3 = vpack.c.bf16 %v974_v1, %v973_v0  ;;  %v1571_v7 = vpack.c.bf16 %v1004_v6, %v1003_v5  ;;  %v976_v14 = vld [vmem:[%s2220_s8 + $0x28] sm:$0xff]  ;;  %v1005_v17 = vld [vmem:[%s2220_s8 + $0x110] sm:$0xff]  ;;  %v1023_v22 = vld [vmem:[%s2220_s8 + $0x1a0] sm:$0xff] }
 0x147   :  { %v570_v31 = vmax.f32 %v394_v21, 0.0  ;;  %v572_v38 = vmax.f32 %v507_v32, 0.0  ;;  %v1545_v11 = vpack.c.bf16 %v992_v9, %v991_v8  ;;  %v1573_v15 = vpack.c.bf16 %v1022_v12, %v1021_v10  ;;  %v994_v21 = vld [vmem:[%s2220_s8 + $0xb8] sm:$0xff]  ;;  %v995_v32 = vld [vmem:[%s2220_s8 + $0xc0] sm:$0xff]  ;;  %v1013_v1 = vld [vmem:[%s2220_s8 + $0x150] sm:$0xff] }
 0x148   :  { %v1495_v33 = vpack.c.bf16 %v569_v25, %v565_v24  ;;  %v1527_v41 = vpack.c.bf16 %v571_v35, %v567_v34  ;;  %v1547_v16 = vpack.c.bf16 %v976_v14, %v975_v13  ;;  %v1575_v19 = vpack.c.bf16 %v1006_v18, %v1005_v17  ;;  %v1024_v24 = vld [vmem:[%s2220_s8 + $0x1a8] sm:$0xff]  ;;  %v977_v25 = vld [vmem:[%s2220_s8 + $0x30] sm:$0xff]  ;;  %v978_v26 = vld [vmem:[%s2220_s8 + $0x38] sm:$0xff] }
 0x149   :  { %v1493_v36 = vpack.c.bf16 %v570_v31, %v566_v30  ;;  %v1525_v42 = vpack.c.bf16 %v572_v38, %v568_v37  ;;  %v1549_v23 = vpack.c.bf16 %v994_v21, %v993_v20  ;;  %v1577_v27 = vpack.c.bf16 %v1024_v24, %v1023_v22  ;;  %v1008_v30 = vld [vmem:[%s2220_s8 + $0x128] sm:$0xff]  ;;  %v1025_v34 = vld [vmem:[%s2220_s8 + $0x1b0] sm:$0xff]  ;;  %v979_v37 = vld [vmem:[%s2220_s8 + $0x40] sm:$0xff] }
 0x14a   :  { %v1551_v28 = vpack.c.bf16 %v978_v26, %v977_v25  ;;  %v1579_v31 = vpack.c.bf16 %v1008_v30, %v1007_v29  ;;  %v980_v38 = vld [vmem:[%s2220_s8 + $0x48] sm:$0xff]  ;;  %v1030_v60 = vld [vmem:[%s2220_s8 + $0x1d8] sm:$0xff]  ;;  %v983_v61 = vld [vmem:[%s2220_s8 + $0x60] sm:$0xff]  ;;  %v899_v25 = vsub.s32 1, %v1854_v4  ;;  %v903_v30 = vsub.s32 2, %v1854_v4 }
 0x14b   :  { %1494 = vmatprep.subr.bf16.mxu1 %v1493_v36  ;;  %1526 = vmatprep.subr.bf16.mxu0 %v1525_v42  ;;  %v1026_v36 = vld [vmem:[%s2220_s8 + $0x1b8] sm:$0xff]  ;;  %v1009_v42 = vld [vmem:[%s2220_s8 + $0x130] sm:$0xff]  ;;  %v1032_v9 = vld [vmem:[%s2220_s8 + $0x1e8] sm:$0xff] }
 0x14c   :  { %1496 = vmatpush1.bf16.xpose.msra.mxu1 %v1495_v33  ;;  %1528 = vmatpush1.bf16.xpose.msra.mxu0 %v1527_v41  ;;  %v996_v33 = vld [vmem:[%s2220_s8 + $0xc8] sm:$0xff]  ;;  %v1555_v41 = vpack.c.bf16 %v980_v38, %v979_v37  ;;  %v1583_v45 = vpack.c.bf16 %v1010_v44, %v1009_v42  ;;  %v1001_v5 = vld [vmem:[%s2220_s8 + $0xf0] sm:$0xff]  ;;  %v1002_v6 = vld [vmem:[%s2220_s8 + $0xf8] sm:$0xff] }
 0x14d   :  { %1530 = vmatprep.subr.bf16.mxu1 %v1529_v39  ;;  %v1553_v35 = vpack.c.bf16 %v996_v33, %v995_v32  ;;  %v1581_v39 = vpack.c.bf16 %v1026_v36, %v1025_v34  ;;  %v1565_v8 = vpack.c.bf16 %v1002_v6, %v1001_v5  ;;  %v985_v10 = vld [vmem:[%s2220_s8 + $0x70] sm:$0xff]  ;;  %v1015_v14 = vld [vmem:[%s2220_s8 + $0x160] sm:$0xff]  ;;  %v1034_v18 = vld [vmem:[%s2220_s8 + $0x1f8] sm:$0xff]  ;;  %v907_v33 = vsub.s32 3, %v1854_v4 }
 0x14e   :  { %v1033_v17 = vld [vmem:[%s2220_s8 + $0x1f0] sm:$0xff]  ;;  %v1018_v21 = vld [vmem:[%s2220_s8 + $0x178] sm:$0xff]  ;;  %v891_v24 = vld [vmem:[%s2218_s6] sm:$0xf] }
 0x14f   :  { %v1017_v20 = vld [vmem:[%s2220_s8 + $0x170] sm:$0xff]  ;;  %v900_v32 = vrot.slane %v891_v24, %v899_v25  ;;  %v904_v42 = vrot.slane %v891_v24, %v903_v30 }
 0x150   :  { %v1599_v22 = vpack.c.bf16 %v1018_v21, %v1017_v20  ;;  %v1201_v20 = vld [vmem:[#allocation5 + $0x18] sm:$0xff]  ;;  %v1218_v21 = vld [vmem:[#allocation5 + $0xa0] sm:$0xff] }
 0x153   :  { %661 = vmatmul.mubr.f32.vlgmr.msra.gmra.mrb[32].mxu1 %v1972_v40  ;;  %731 = vmatmul.mubr.f32.vlgmr.msra.gmra.mrb[32].mxu0 %v1977_v43  ;;  %v987_v40 = vld [vmem:[%s2220_s8 + $0x80] sm:$0xff]  ;;  %v972_v43 = vld [vmem:[%s2220_s8 + $0x8] sm:$0xff] }
 0x154   :  { %1532 = vmatpush1.bf16.msra.mxu1 %v1531_v48  ;;  %813 = vmatprep.mubr.f32.mxu1 %v1756_v52  ;;  %v1537_v56 = vpack.c.bf16 %v988_v55, %v987_v40  ;;  %v1539_v58 = vpack.c.bf16 %v972_v43, %v971_v57  ;;  %v1027_v48 = vld [vmem:[%s2220_s8 + $0x1c0] sm:$0xff]  ;;  %v1012_v55 = vld [vmem:[%s2220_s8 + $0x148] sm:$0xff] }
 0x155   :  { %1534 = vmatprep.subr.bf16.mxu1 %v1533_v49  ;;  %v1557_v49 = vpack.c.bf16 %v998_v47, %v997_v46  ;;  %v1011_v40 = vld [vmem:[%s2220_s8 + $0x140] sm:$0xff]  ;;  %v1000_v43 = vld [vmem:[%s2220_s8 + $0xe8] sm:$0xff] }
 0x156   :  { %1538 = vmatprep.subr.bf16.mxu0 %v1537_v56  ;;  %v1587_v56 = vpack.c.bf16 %v1012_v55, %v1011_v40  ;;  %v999_v57 = vld [vmem:[%s2220_s8 + $0xe0] sm:$0xff] }
 0x157   :  { %1350 = vmatmul.mubr.msk.f32.vlgmr.msra.gmra.mrb[34].mxu1 %vm745_vm2, %v736_v53  ;;  %1540 = vmatpush3.bf16.msra.mxu0 %v1539_v58  ;;  %v1029_v58 = vld [vmem:[%s2220_s8 + $0x1d0] sm:$0xff]  ;;  %v1561_v59 = vpack.c.bf16 %v1000_v43, %v999_v57 }
 0x158   :  { %1536 = vmatpush1.bf16.msra.mxu1 %v1535_v54  ;;  %884 = vmatprep.mubr.f32.mxu1 %v1756_v52  ;;  %v982_v52 = vld [vmem:[%s2220_s8 + $0x58] sm:$0xff]  ;;  %v1589_v63 = vpack.c.bf16 %v1030_v60, %v1029_v58 }
 0x159   :  { %1542 = vmatprep.subr.bf16.mxu0 %v1541_v62  ;;  %1570 = vmatprep.subr.bf16.mxu1 %v1569_v2  ;;  %v1559_v54 = vpack.c.bf16 %v982_v52, %v981_v51  ;;  %v984_v62 = vld [vmem:[%s2220_s8 + $0x68] sm:$0xff]  ;;  %v1014_v2 = vld [vmem:[%s2220_s8 + $0x158] sm:$0xff] }
 0x15a   :  { %v1563_v0 = vpack.c.bf16 %v984_v62, %v983_v61 }
 0x15b   :  { %1351 = vmatmul.mubr.msk.f32.vlgmr.msra.gmra.mrb[36].mxu1 %vm745_vm2, %v736_v53  ;;  %1544 = vmatpush3.bf16.msra.mxu0 %v1543_v3  ;;  %v1585_v53 = vpack.c.bf16 %v1028_v50, %v1027_v48  ;;  %v1591_v3 = vpack.c.bf16 %v1014_v2, %v1013_v1 }
 0x15c   :  { %1572 = vmatpush3.bf16.msra.mxu1 %v1571_v7  ;;  %1546 = vmatprep.subr.bf16.mxu0 %v1545_v11  ;;  %v1031_v7 = vld [vmem:[%s2220_s8 + $0x1e0] sm:$0xff]  ;;  %v986_v11 = vld [vmem:[%s2220_s8 + $0x78] sm:$0xff] }
 0x15d   :  { %1574 = vmatprep.subr.bf16.mxu1 %v1573_v15  ;;  %v1593_v12 = vpack.c.bf16 %v1032_v9, %v1031_v7  ;;  %v1567_v13 = vpack.c.bf16 %v986_v11, %v985_v10  ;;  %v1016_v15 = vld [vmem:[%s2220_s8 + $0x168] sm:$0xff]  ;;  %v1214_v10 = vld [vmem:[#allocation5 + $0x80] sm:$0xff] }
 0x15e   :  { %v1215_v11 = vld [vmem:[#allocation5 + $0x88] sm:$0xff] }
 0x15f   :  { %1548 = vmatpush3.bf16.msra.mxu0 %v1547_v16  ;;  %v1595_v16 = vpack.c.bf16 %v1016_v15, %v1015_v14  ;;  %v1199_v14 = vld [vmem:[#allocation5 + $0x8] sm:$0xff] }
 0x160   :  { %1576 = vmatpush3.bf16.msra.mxu1 %v1575_v19  ;;  %1550 = vmatprep.subr.bf16.mxu0 %v1549_v23  ;;  %v1597_v19 = vpack.c.bf16 %v1034_v18, %v1033_v17  ;;  %v895_v23 = vsub.s32 0, %v1854_v4  ;;  %v1217_v17 = vld [vmem:[#allocation5 + $0x98] sm:$0xff]  ;;  %v1200_v18 = vld [vmem:[#allocation5 + $0x10] sm:$0xff] }
 0x161   :  { %1578 = vmatprep.subr.bf16.mxu1 %v1577_v27  ;;  %v917_v27 = vld [vmem:[%s2219_s7] sm:$0xf] }
 0x162   :  { %v896_v29 = vrot.slane %v891_v24, %v895_v23  ;;  %v926_v38 = vrot.slane %v917_v27, %v899_v25  ;;  %v930_v47 = vrot.slane %v917_v27, %v903_v30  ;;  %v934_v50 = vrot.slane %v917_v27, %v907_v33  ;;  %v1202_v25 = vld [vmem:[#allocation5 + $0x20] sm:$0xff] }
 0x163   :  { %1552 = vmatpush3.bf16.msra.mxu0 %v1551_v28 }
 0x164   :  { %1580 = vmatpush3.bf16.msra.mxu1 %v1579_v31  ;;  %1554 = vmatprep.subr.bf16.mxu0 %v1553_v35  ;;  %v922_v35 = vrot.slane %v917_v27, %v895_v23  ;;  %v1607_v23 = vpack.c.bf16 %v1201_v20, %v1200_v18  ;;  %v1220_v27 = vld [vmem:[#allocation5 + $0xb0] sm:$0xff] }
 0x165   :  { %1582 = vmatprep.subr.bf16.mxu1 %v1581_v39 }
 0x167   :  { %1556 = vmatpush3.bf16.msra.mxu0 %v1555_v41 }
 0x168   :  { %1584 = vmatpush3.bf16.msra.mxu1 %v1583_v45  ;;  %1558 = vmatprep.subr.bf16.mxu0 %v1557_v49  ;;  %v908_v45 = vrot.slane %v891_v24, %v907_v33  ;;  %v1222_v33 = vld [vmem:[#allocation5 + $0xc0] sm:$0xff] }
 0x169   :  { %1586 = vmatprep.subr.bf16.mxu1 %v1585_v53 }
 0x16b   :  { %1560 = vmatpush3.bf16.msra.mxu0 %v1559_v54 }
 0x16c   :  { %1588 = vmatpush3.bf16.msra.mxu1 %v1587_v56  ;;  %1562 = vmatprep.subr.bf16.mxu0 %v1561_v59 }
 0x16d   :  { %1590 = vmatprep.subr.bf16.mxu1 %v1589_v63 }
 0x16f   :  { %1564 = vmatpush3.bf16.msra.mxu0 %v1563_v0 }
 0x170   :  { %1592 = vmatpush3.bf16.msra.mxu1 %v1591_v3  ;;  %1566 = vmatprep.subr.bf16.mxu0 %v1565_v8 }
 0x171   :  { %1594 = vmatprep.subr.bf16.mxu1 %v1593_v12  ;;  %v1601_v12 = vpack.c.bf16 %v1215_v11, %v1214_v10 }
 0x173   :  { %1568 = vmatpush3.bf16.msra.mxu0 %v1567_v13  ;;  %v1198_v13 = vld [vmem:[#allocation5] sm:$0xff] }
 0x174   :  { %1596 = vmatpush3.bf16.msra.mxu1 %v1595_v16  ;;  %v1603_v15 = vpack.c.bf16 %v1199_v14, %v1198_v13  ;;  %v1216_v16 = vld [vmem:[#allocation5 + $0x90] sm:$0xff]  ;;  %1602 = vmatprep.subr.bf16.mxu0 %v1601_v12  ;;  %v1359_v12 = vld [vmem:[%s2224_s12] ss:$0 sm:$0xff] }
 0x175   :  { %1598 = vmatprep.subr.bf16.mxu1 %v1597_v19  ;;  %v1605_v19 = vpack.c.bf16 %v1217_v17, %v1216_v16 }
 0x178   :  { %1600 = vmatpush3.bf16.msra.mxu1 %v1599_v22  ;;  %v1219_v22 = vld [vmem:[#allocation5 + $0xa8] sm:$0xff] }
 0x179   :  { %v1609_v24 = vpack.c.bf16 %v1219_v22, %v1218_v21 }
 0x226   :  { %v662_v26 = vpop.f32.mrb[32].mxu1  ;;  %v732_v31 = vpop.f32.mrb[32].mxu0 }
 0x227   :  { %v664_v28 = vpop.f32.mrb[33].mxu1  ;;  %v2188_v34 = vadd.f32 %v732_v31, %v662_v26  ;;  %v734_v36 = vpop.f32.mrb[33].mxu0  ;;  %v1203_v26 = vld [vmem:[#allocation5 + $0x28] sm:$0xff]  ;;  %v1204_v31 = vld [vmem:[#allocation5 + $0x30] sm:$0xff] }
 0x228   :  { %v1221_v28 = vld [vmem:[#allocation5 + $0xb8] sm:$0xff] }
 0x229   :  { %v1613_v30 = vpack.c.bf16 %v1221_v28, %v1220_v27 }
 0x22a   :  { %v815_v37 = vpop.f32.mrb[34].mxu1 }
 0x22b   :  { %v913_v39 = vmul.f32 %v896_v29, %v815_v37  ;;  %v817_v41 = vpop.f32.mrb[35].mxu1  ;;  %v1611_v29 = vpack.c.bf16 %v1203_v26, %v1202_v25 }
 0x22c   :  { %v914_v44 = vmul.f32 %v900_v32, %v817_v41  ;;  %v1205_v32 = vld [vmem:[#allocation5 + $0x38] sm:$0xff]  ;;  %v1224_v41 = vld [vmem:[#allocation5 + $0xd0] sm:$0xff] }
 0x22d   :  { %v939_v46 = vadd.f32 %v922_v35, %v913_v39  ;;  %v1223_v35 = vld [vmem:[#allocation5 + $0xc8] sm:$0xff]  ;;  %v1615_v36 = vpack.c.bf16 %v1205_v32, %v1204_v31 }
 0x22e   :  { %v940_v48 = vadd.f32 %v926_v38, %v914_v44  ;;  %v886_v49 = vpop.f32.mrb[36].mxu1  ;;  %v1617_v37 = vpack.c.bf16 %v1223_v35, %v1222_v33  ;;  %v1206_v38 = vld [vmem:[#allocation5 + $0x40] sm:$0xff]  ;;  %v1207_v39 = vld [vmem:[#allocation5 + $0x48] sm:$0xff] }
 0x22f   :  { %v1352_v51 = vmul.f32 -1.442695, %v939_v46  ;;  %v915_v52 = vmul.f32 %v904_v42, %v886_v49  ;;  %v888_v53 = vpop.f32.mrb[37].mxu1  ;;  %v1225_v42 = vld [vmem:[#allocation5 + $0xd8] sm:$0xff]  ;;  %v1619_v44 = vpack.c.bf16 %v1207_v39, %v1206_v38  ;;  %v1227_v49 = vld [vmem:[#allocation5 + $0xe8] sm:$0xff] }
 0x230   :  { %v1353_v4 = vmul.f32 -1.442695, %v940_v48  ;;  %v916_v54 = vmul.f32 %v908_v45, %v888_v53  ;;  %v1621_v45 = vpack.c.bf16 %v1225_v42, %v1224_v41  ;;  %v1211_v53 = vld [vmem:[#allocation5 + $0x68] sm:$0xff] }
 0x231   :  { %1656 = vpow2.f32 %v1352_v51  ;;  %v941_v40 = vadd.f32 %v930_v47, %v915_v52  ;;  %v1209_v47 = vld [vmem:[#allocation5 + $0x58] sm:$0xff]  ;;  %v1210_v52 = vld [vmem:[#allocation5 + $0x60] sm:$0xff] }
 0x232   :  { %1658 = vpow2.f32 %v1353_v4  ;;  %v942_v55 = vadd.f32 %v934_v50, %v916_v54  ;;  %v1228_v4 = vld [vmem:[#allocation5 + $0xf0] sm:$0xff]  ;;  %v1229_v54 = vld [vmem:[#allocation5 + $0xf8] sm:$0xff] }
 0x233   :  { %v1354_v56 = vmul.f32 -1.442695, %v941_v40 }
 0x234   :  { %v1355_v57 = vmul.f32 -1.442695, %v942_v55 }
 0x235   :  { %1660 = vpow2.f32 %v1354_v56  ;;  %v1212_v56 = vld [vmem:[#allocation5 + $0x70] sm:$0xff] }
 0x236   :  { %1662 = vpow2.f32 %v1355_v57  ;;  %v1213_v57 = vld [vmem:[#allocation5 + $0x78] sm:$0xff] }
 0x23b   :  { %v1657_v43 = vpop.eup %1656 }
 0x23c   :  { %v1659_v58 = vpop.eup %1658  ;;  %v955_v59 = vadd.f32 1.0, %v1657_v43  ;;  %v1631_v43 = vpack.c.bf16 %v1213_v57, %v1212_v56 }
 0x23d   :  { %v956_v60 = vadd.f32 1.0, %v1659_v58 }
 0x23e   :  { %1664 = vrcp.f32 %v955_v59 }
 0x23f   :  { %v1661_v61 = vpop.eup %1660  ;;  %1666 = vrcp.f32 %v956_v60 }
 0x240   :  { %v1663_v62 = vpop.eup %1662  ;;  %v957_v63 = vadd.f32 1.0, %v1661_v61 }
 0x241   :  { %v958_v0 = vadd.f32 1.0, %v1663_v62 }
 0x242   :  { %1668 = vrcp.f32 %v957_v63 }
 0x243   :  { %1670 = vrcp.f32 %v958_v0  ;;  %v1356_v0 = vld [vmem:[%s2221_s9] ss:$0 sm:$0xff] }
 0x248   :  { %v1665_v1 = vpop.eup %1664 }
 0x249   :  { %v1667_v2 = vpop.eup %1666  ;;  %v967_v5 = vmul.f32 %v1665_v1, %v939_v46  ;;  %v1208_v46 = vld [vmem:[#allocation5 + $0x50] sm:$0xff] }
 0x24a   :  { %v968_v3 = vmul.f32 %v1667_v2, %v940_v48  ;;  %v1226_v48 = vld [vmem:[#allocation5 + $0xe0] sm:$0xff]  ;;  %v1623_v50 = vpack.c.bf16 %v1209_v47, %v1208_v46 }
 0x24b   :  { %v1625_v51 = vpack.c.bf16 %v1227_v49, %v1226_v48  ;;  %v1357_v2 = vld [vmem:[%s2222_s10] ss:$0 sm:$0xff]  ;;  %s1314_s10 = sshll.u32 %s1757_s21, 4  ;;  %s1315_s10 = int_to_ptr.vmem [resolvable:$true] %s1314_s10 }
 0x24c   :  { %v1669_v6 = vpop.eup %1668  ;;  %1099 = vmatprep.mubr.f32.mxu0 %v968_v3  ;;  %s1720_s0 = scalar_lea.vmem %s1315_s10, 32  ;;  %p1725_p3 = scmp.lt.s32.totalorder %s1315_s10, %s1315_s10 }
 0x24d   :  { %v1671_v7 = vpop.eup %1670  ;;  %1100 = vmatmul.mubr.f32.vlgmr.msra.gmra.mrb[34].mxu0 %v967_v5  ;;  %v969_v9 = vmul.f32 %v1669_v6, %v941_v40  ;;  %v1627_v40 = vpack.c.bf16 %v1211_v53, %v1210_v52  ;;  %p1721_p2 = scmp.ne.s32.totalorder %s1315_s10, %s1720_s0  ;;  %p1726_p4 = scmp.lt.s32.totalorder %s1720_s0, %s1720_s0 }
 0x24e   :  { %v970_v8 = vmul.f32 %v1671_v7, %v942_v55  ;;  %1604 = vmatpush3.bf16.msra.mxu0 %v1603_v15  ;;  %v1629_v55 = vpack.c.bf16 %v1229_v54, %v1228_v4 }
 0x24f   :  { %1606 = vmatprep.subr.bf16.mxu0 %v1605_v19  ;;  %p1727_p5 = por %p1726_p4, %p1725_p3 }
 0x250   :  { %1169 = vmatprep.mubr.f32.mxu1 %v970_v8 }
 0x251   :  { %1170 = vmatmul.mubr.f32.vlgmr.msra.gmra.mrb[38].mxu1 %v969_v9  ;;  %p1728_p6 = pnand %p1727_p5, %p1721_p2 }
 0x252   :  { %1608 = vmatpush3.bf16.msra.mxu0 %v1607_v23 }
 0x253   :  { %1610 = vmatprep.subr.bf16.mxu0 %v1609_v24 }
 0x256   :  { %1612 = vmatpush3.bf16.msra.mxu0 %v1611_v29 }
 0x257   :  { %1614 = vmatprep.subr.bf16.mxu0 %v1613_v30 }
 0x25a   :  { %1616 = vmatpush3.bf16.msra.mxu0 %v1615_v36 }
 0x25b   :  { %1618 = vmatprep.subr.bf16.mxu0 %v1617_v37 }
 0x25e   :  { %1620 = vmatpush3.bf16.msra.mxu0 %v1619_v44 }
 0x25f   :  { %1622 = vmatprep.subr.bf16.mxu0 %v1621_v45 }
 0x262   :  { %1624 = vmatpush3.bf16.msra.mxu0 %v1623_v50 }
 0x263   :  { %1626 = vmatprep.subr.bf16.mxu0 %v1625_v51 }
 0x266   :  { %1628 = vmatpush3.bf16.msra.mxu0 %v1627_v40 }
 0x267   :  { %1630 = vmatprep.subr.bf16.mxu0 %v1629_v55 }
 0x26a   :  { %1632 = vmatpush3.bf16.msra.mxu0 %v1631_v43 }
 0x320   :  { %v1392_v58 = vpop.f32.mrb[34].mxu0 }
 0x321   :  { %v1393_v59 = vpop.f32.mrb[35].mxu0 }
 0x322   :  { %v1394_v60 = vadd.f32 %v1393_v59, %v1392_v58 }
 0x324   :  { %v1427_v61 = vpop.f32.mrb[38].mxu1 }
 0x325   :  { %v1428_v62 = vpop.f32.mrb[39].mxu1 }
 0x326   :  { %v1429_v63 = vadd.f32 %v1428_v62, %v1427_v61 }
 0x328   :  { %v1172_v1 = vadd.f32 %v1429_v63, %v1394_v60 }
 0x32a   :  { %v1182_v3 = vmul.f32 %v1356_v0, %v1172_v1 }
 0x32c   :  { %v1190_v5 = vadd.f32 %v1357_v2, %v1182_v3 }
 0x32e   :  { %v1358_v6 = vmul.f32 -1.442695, %v1190_v5 }
 0x330   :  { %1672 = vpow2.f32 %v1358_v6 }
 0x33a   :  { %v1673_v7 = vpop.eup %1672 }
 0x33b   :  { %v1194_v8 = vadd.f32 1.0, %v1673_v7 }
 0x33d   :  { %1674 = vrcp.f32 %v1194_v8 }
 0x347   :  { %v1675_v9 = vpop.eup %1674 }
 0x348   :  { %v1197_v10 = vmul.f32 %v1675_v9, %v1190_v5 }
 0x34a   :  { %1301 = vmatprep.mubr.f32.mxu0 %v1197_v10 }
 0x34b   :  { %1302 = vmatmul.mubr.f32.vlgmr.msra.gmra.mrb[36].mxu0 %v2188_v34 }
 0x41e   :  { %v1462_v11 = vpop.f32.mrb[36].mxu0 }
 0x41f   :  { %v1463_v13 = vpop.f32.mrb[37].mxu0 }
 0x420   :  { %v1464_v14 = vadd.f32 %v1463_v13, %v1462_v11 }
 0x422   :  { %v1304_v15 = vadd.f32 %v1464_v14, %v1359_v12 }
 0x424   :  { %1307 = vst [vmem:[#allocation7] sm:$0x3] %v1304_v15 }
 0x425   :  { %1731 = shalt.err (!%p1728_p6)
}
 0x426   :  { %s1732_s23 = scalar_lea.hbm %s2225_s13, 32 }
 0x427   :  { %p1733_p7 = scmp.ne.s32.totalorder %s2225_s13, %s1732_s23  ;;  %p1736_p8 = scmp.lt.u32.totalorder %s1732_s23, %s2225_s13 }
 0x429   :  { %p1738_p9 = pnand %p1736_p8, %p1733_p7 }
 0x42b   :  { %1741 = shalt.err (!%p1738_p9)
}
 0x42c   :  { %1317 = dma.vmem_to_hbm [thread:$0]  %s1315_s10, 32, %s2225_s13, [#allocation4]  }
 0x42d   :  { %1746 = dma.done.wait [#allocation4], 32  }
 0x42e   :  { %1747 = vsyncadd [#allocation4], 4294967264 }
 0x42f   :  { %1321 = vsyncpa [#allocation3], 1 }
 0x430   :  { %1322 = vsyncpa [#allocation6], 1 }
 0x431   :  { %1323 = vsyncpa [#allocation4], 1 }

</bundles_post_ra>
